<compile_context>
chip_gen: v7x
topology: tpu7x:2x2x1
jax: 0.10.0
libtpu: 0.0.40
codegen_flags: <defaults>
</compile_context>

<pallas_src>
import functools

import jax
import jax.numpy as jnp
from jax.experimental import pallas as pl
from jax.experimental.pallas import tpu as pltpu

# small compat shim (newer jax: CompilerParams; older: TPUCompilerParams)
_CompilerParams = getattr(pltpu, "CompilerParams",
                          getattr(pltpu, "TPUCompilerParams", None))


def _round_up(n, m):
    return ((n + m - 1) // m) * m


# ----------------------------- fused Pallas kernel --------------------------

def _fused_branch_kernel(x_ref, eps_ref, wml_ref, bml_ref, wdo_ref, bdo_ref,
                         sk_ref, out_ref, sse_ref, kl_ref, *,
                         n_valid, latent_dim, tile_rows):
    """One row tile of one branch: pre-proj + encoder + VAE heads + rsample
    + skeleton bias + decoder + post-proj + SSE/KL partial sums, all in VMEM."""
    x = x_ref[...]                                          # (TILE, F) f32

    # x @ (W_proc @ W_enc @ [W_mu | W_logvar]) + fused bias -> [mu | logvar]
    ml = jnp.dot(x.astype(jnp.bfloat16), wml_ref[...],
                 preferred_element_type=jnp.float32) + bml_ref[...]
    mu = ml[:, :latent_dim]
    logvar = ml[:, latent_dim:]

    std = jnp.exp(0.5 * logvar)                             # logvar.exp().pow(0.5)
    lat = mu + std * eps_ref[...] + sk_ref[...]             # rsample + skeleton bias

    # lat @ (W_dec @ W_post) + fused bias -> reconstruction
    out = jnp.dot(lat.astype(jnp.bfloat16), wdo_ref[...],
                  preferred_element_type=jnp.float32) + bdo_ref[...]
    out_ref[...] = out

    # valid-row mask (last tile may be zero-padded rows)
    row0 = pl.program_id(0) * tile_rows
    row = row0 + jax.lax.broadcasted_iota(jnp.int32, (tile_rows, 1), 0)
    valid = row < n_valid

    # per-tile partial sums (reduced in the wrapper -> grid stays fully parallel)
    err = jnp.where(valid, out - x, 0.0)
    sse = jnp.sum(err * err)
    var = std * std                                         # reuse std; no 2nd exp
    kl = jnp.where(valid, 0.5 * (var + mu * mu - 1.0 - logvar), 0.0)
    kls = jnp.sum(kl)
    sse_ref[...] = jnp.full(sse_ref.shape, sse, jnp.float32)
    kl_ref[...] = jnp.full(kl_ref.shape, kls, jnp.float32)


def fused_branch_forward(x2d, eps, w_ml, b_ml, w_do, b_do, sk_row, *,
                         n_valid, tile_rows):
    n_pad, f = x2d.shape
    latent_dim = eps.shape[1]
    num_tiles = n_pad // tile_rows

    kernel = functools.partial(_fused_branch_kernel, n_valid=n_valid,
                               latent_dim=latent_dim, tile_rows=tile_rows)

    def row_spec(c):
        return pl.BlockSpec((tile_rows, c), lambda i: (i, 0))

    def full_spec(shape):
        return pl.BlockSpec(shape, lambda i: tuple(0 for _ in shape))

    cp = (_CompilerParams(dimension_semantics=("parallel",))
          if _CompilerParams is not None else None)

    out, sse_p, kl_p = pl.pallas_call(
        kernel,
        grid=(num_tiles,),
        in_specs=[
            row_spec(f),                        # x tile
            row_spec(latent_dim),               # eps tile
            full_spec(w_ml.shape),              # (F, 2L) bf16, resident
            full_spec(b_ml.shape),              # (1, 2L) f32
            full_spec(w_do.shape),              # (L, F) bf16
            full_spec(b_do.shape),              # (1, F) f32
            full_spec(sk_row.shape),            # (1, L) f32 skeleton bias
        ],
        out_specs=(
            row_spec(f),                                        # reconstruction
            pl.BlockSpec((1, 8, 128), lambda i: (i, 0, 0)),     # SSE partials
            pl.BlockSpec((1, 8, 128), lambda i: (i, 0, 0)),     # KL partials
        ),
        out_shape=(
            jax.ShapeDtypeStruct((n_pad, f), jnp.float32),
            jax.ShapeDtypeStruct((num_tiles, 8, 128), jnp.float32),
            jax.ShapeDtypeStruct((num_tiles, 8, 128), jnp.float32),
        ),
        compiler_params=cp,
    )(x2d, eps, w_ml, b_ml, w_do, b_do, sk_row)
    return out, sse_p[:, 0, 0], kl_p[:, 0, 0]


# ------------------------------ model wrapper -------------------------------

class MultiEncoderVAEv2Pallas:
    def __init__(self, nfeats, latent_dim, lambdas, common_nfeats=32,
                 key=None, tile_rows=4096):
        self.nfeats = list(nfeats)
        self.n_branches = len(nfeats)
        self.latent_dim = latent_dim
        self.common_nfeats = common_nfeats
        self.lambdas = dict(lambdas)
        self.modality = 'motion'
        self.tile_rows = tile_rows          # row tile sized for v7x 64 MiB VMEM

        if key is None:
            key = jax.random.PRNGKey(0)
        keys = jax.random.split(key, 2 * self.n_branches + 5)
        proc_keys = keys[:self.n_branches]
        post_keys = keys[self.n_branches:2 * self.n_branches]
        k_enc, k_mu, k_lv, k_dec, k_sk = keys[2 * self.n_branches:]

        def lin(k, fin, fout):
            kw, kb = jax.random.split(k)
            w = jax.random.normal(kw, (fin, fout), jnp.float32) / jnp.sqrt(
                jnp.float32(fin))
            b = jax.random.normal(kb, (fout,), jnp.float32) * 0.01
            return w, b

        # raw (unfolded) parameters, mirroring the PyTorch module structure
        self.proc = [lin(proc_keys[i], self.nfeats[i], common_nfeats)
                     for i in range(self.n_branches)]
        self.w_enc, self.b_enc = lin(k_enc, common_nfeats, latent_dim)
        self.w_mu, self.b_mu = lin(k_mu, latent_dim, latent_dim)
        self.w_lv, self.b_lv = lin(k_lv, latent_dim, latent_dim)
        self.w_dec, self.b_dec = lin(k_dec, latent_dim, common_nfeats)
        self.post = [lin(post_keys[i], common_nfeats, self.nfeats[i])
                     for i in range(self.n_branches)]
        self.skeleton_biases = jax.random.normal(
            k_sk, (self.n_branches, latent_dim), jnp.float32)

        # ---- fold the kernel-size-1 linear chains (exact algebra) ----
        w_enc_mu = self.w_enc @ self.w_mu                  # (C, L)
        w_enc_lv = self.w_enc @ self.w_lv
        b_enc_mu = self.b_enc @ self.w_mu + self.b_mu      # (L,)
        b_enc_lv = self.b_enc @ self.w_lv + self.b_lv
        self.folded = []
        for i in range(self.n_branches):
            wp, bp = self.proc[i]
            wq, bq = self.post[i]
            w_ml = jnp.concatenate([wp @ w_enc_mu, wp @ w_enc_lv], axis=1)
            b_ml = jnp.concatenate([bp @ w_enc_mu + b_enc_mu,
                                    bp @ w_enc_lv + b_enc_lv])
            w_do = self.w_dec @ wq
            b_do = self.b_dec @ wq + bq
            self.folded.append((
                w_ml.astype(jnp.bfloat16),            # (F_i, 2L) bf16 MXU input
                b_ml.reshape(1, -1),                  # (1, 2L)   f32
                w_do.astype(jnp.bfloat16),            # (L, F_i)  bf16
                b_do.reshape(1, -1),                  # (1, F_i)  f32
            ))

        self._jit_forward = jax.jit(self._forward_fn)

    def _forward_fn(self, xs, eps_key):
        eps_keys = jax.random.split(eps_key, self.n_branches)
        outs, loss = [], {}
        kl_sum, kl_count = 0.0, 0
        for i, x in enumerate(xs):
            B, T, F = x.shape
            n_rows = B * T
            tile = min(self.tile_rows, _round_up(n_rows, 8))
            n_pad = _round_up(n_rows, tile)
            x2d = x.reshape(n_rows, F)
            if n_pad != n_rows:
                x2d = jnp.pad(x2d, ((0, n_pad - n_rows), (0, 0)))
            # TODO(synk): eps could be drawn in-kernel (pltpu.prng_*) to save an
            # HBM read; kept as an explicit N(0,1) input for exact rsample().
            eps = jax.random.normal(eps_keys[i], (n_pad, self.latent_dim),
                                    jnp.float32)
            w_ml, b_ml, w_do, b_do = self.folded[i]
            sk_row = self.skeleton_biases[i].reshape(1, -1)
            out_pad, sse_parts, kl_parts = fused_branch_forward(
                x2d, eps, w_ml, b_ml, w_do, b_do, sk_row,
                n_valid=n_rows, tile_rows=tile)
            outs.append(out_pad[:n_rows].reshape(B, T, F))
            loss[f'recons{i}'] = jnp.sum(sse_parts) / (n_rows * F)   # MSE mean
            kl_sum = kl_sum + jnp.sum(kl_parts)
            kl_count += n_rows * self.latent_dim
        loss['kl'] = kl_sum / kl_count            # mean elementwise KL vs N(0,1)
        total = sum(self.lambdas[k] * v for k, v in loss.items())
        return tuple(outs), total, loss

    def forward(self, batches, eps_key):
        xs = tuple(b[self.modality] for b in batches)
        outs, total_loss, loss = self._jit_forward(xs, eps_key)
        # Loss values stay as device scalars; convert to Python floats outside
        # the training step to avoid a per-step host sync.
        return list(outs), total_loss, dict(loss)


# ---------------------------------- main -------------------------------------

if __name__ == "__main__":
    key = jax.random.PRNGKey(0)
    k_param, k_x0, k_x1, k_eps = jax.random.split(key, 4)

    B, T = 2, 8
    nfeats = [8, 16]
    latent_dim = 16
    common_nfeats = 32
    lambdas = {'recons0': 1.0, 'recons1': 1.0, 'kl': 1e-4}

    model = MultiEncoderVAEv2Pallas(nfeats, latent_dim, lambdas,
                                    common_nfeats=common_nfeats, key=k_param)

    batches = [
        {'motion': jax.random.normal(k_x0, (B, T, nfeats[0]), jnp.float32)},
        {'motion': jax.random.normal(k_x1, (B, T, nfeats[1]), jnp.float32)},
    ]

    outs, total_loss, loss_dict = model.forward(batches, k_eps)
    jax.block_until_ready(outs)
    total_loss = jax.block_until_ready(total_loss)
    assert outs[0].shape == (B, T, nfeats[0])
    assert outs[1].shape == (B, T, nfeats[1])
    assert bool(jnp.isfinite(total_loss))
    print("KERNEL_OK")
</pallas_src>

<mosaic_0001>
module attributes {stable_mosaic.version = 11 : i64} {
  func.func @_fused_branch_kernel(%arg0: i32, %arg1: memref<16x8xf32, #tpu.memory_space<vmem>>, %arg2: memref<16x16xf32, #tpu.memory_space<vmem>>, %arg3: memref<8x32xbf16, #tpu.memory_space<vmem>>, %arg4: memref<1x32xf32, #tpu.memory_space<vmem>>, %arg5: memref<16x8xbf16, #tpu.memory_space<vmem>>, %arg6: memref<1x8xf32, #tpu.memory_space<vmem>>, %arg7: memref<1x16xf32, #tpu.memory_space<vmem>>, %arg8: memref<16x8xf32, #tpu.memory_space<vmem>>, %arg9: memref<1x8x128xf32, #tpu.memory_space<vmem>>, %arg10: memref<1x8x128xf32, #tpu.memory_space<vmem>>) attributes {dimension_semantics = [#tpu.dimension_semantics<parallel>], iteration_bounds = array<i64: 1>, scalar_prefetch = 0 : i64, scratch_operands = 0 : i64, tpu.core_type = #tpu.core_type<tc>, window_params = [{transform_indices = @transform_0, window_bounds = array<i64: 16, 8>}, {transform_indices = @transform_1, window_bounds = array<i64: 16, 16>}, {pipeline_mode = #tpu.pipeline_mode<synchronous>, transform_indices = @transform_2, window_bounds = array<i64: 8, 32>}, {pipeline_mode = #tpu.pipeline_mode<synchronous>, transform_indices = @transform_3, window_bounds = array<i64: 1, 32>}, {pipeline_mode = #tpu.pipeline_mode<synchronous>, transform_indices = @transform_4, window_bounds = array<i64: 16, 8>}, {pipeline_mode = #tpu.pipeline_mode<synchronous>, transform_indices = @transform_5, window_bounds = array<i64: 1, 8>}, {pipeline_mode = #tpu.pipeline_mode<synchronous>, transform_indices = @transform_6, window_bounds = array<i64: 1, 16>}, {transform_indices = @transform_7, window_bounds = array<i64: 16, 8>}, {transform_indices = @transform_8, window_bounds = array<i64: 1, 8, 128>}, {transform_indices = @transform_9, window_bounds = array<i64: 1, 8, 128>}]} {
    %c0 = arith.constant 0 : index
    %c0_0 = arith.constant 0 : index
    %0 = vector.load %arg1[%c0, %c0_0] : memref<16x8xf32, #tpu.memory_space<vmem>>, vector<16x8xf32>
    %1 = arith.truncf %0 : vector<16x8xf32> to vector<16x8xbf16>
    %c0_1 = arith.constant 0 : index
    %c0_2 = arith.constant 0 : index
    %2 = vector.load %arg3[%c0_1, %c0_2] : memref<8x32xbf16, #tpu.memory_space<vmem>>, vector<8x32xbf16>
    %cst = arith.constant dense<0.000000e+00> : vector<16x32xf32>
    %3 = tpu.matmul %1, %2, %cst {dimension_numbers = #tpu.dot_dimension_numbers<[1], [0], [0], [1], [0, 0, 1, 1], [], []>} : vector<16x8xbf16>, vector<8x32xbf16>, vector<16x32xf32> -> vector<16x32xf32>
    %c0_3 = arith.constant 0 : index
    %c0_4 = arith.constant 0 : index
    %4 = vector.load %arg4[%c0_3, %c0_4] : memref<1x32xf32, #tpu.memory_space<vmem>>, vector<1x32xf32>
    %5 = vector.broadcast %4 : vector<1x32xf32> to vector<16x32xf32>
    %6 = arith.addf %3, %5 : vector<16x32xf32>
    %7 = vector.extract_strided_slice %6 {offsets = [0, 0], sizes = [16, 16], strides = [1, 1]} : vector<16x32xf32> to vector<16x16xf32>
    %8 = vector.extract_strided_slice %6 {offsets = [0, 16], sizes = [16, 16], strides = [1, 1]} : vector<16x32xf32> to vector<16x16xf32>
    %cst_5 = arith.constant 5.000000e-01 : f32
    %9 = vector.broadcast %cst_5 : f32 to vector<16x16xf32>
    %10 = arith.mulf %9, %8 : vector<16x16xf32>
    %11 = math.exp %10 : vector<16x16xf32>
    %c0_6 = arith.constant 0 : index
    %c0_7 = arith.constant 0 : index
    %12 = vector.load %arg2[%c0_6, %c0_7] : memref<16x16xf32, #tpu.memory_space<vmem>>, vector<16x16xf32>
    %13 = arith.mulf %11, %12 : vector<16x16xf32>
    %14 = arith.addf %7, %13 : vector<16x16xf32>
    %c0_8 = arith.constant 0 : index
    %c0_9 = arith.constant 0 : index
    %15 = vector.load %arg7[%c0_8, %c0_9] : memref<1x16xf32, #tpu.memory_space<vmem>>, vector<1x16xf32>
    %16 = vector.broadcast %15 : vector<1x16xf32> to vector<16x16xf32>
    %17 = arith.addf %14, %16 : vector<16x16xf32>
    %18 = arith.truncf %17 : vector<16x16xf32> to vector<16x16xbf16>
    %c0_10 = arith.constant 0 : index
    %c0_11 = arith.constant 0 : index
    %19 = vector.load %arg5[%c0_10, %c0_11] : memref<16x8xbf16, #tpu.memory_space<vmem>>, vector<16x8xbf16>
    %cst_12 = arith.constant dense<0.000000e+00> : vector<16x8xf32>
    %20 = tpu.matmul %18, %19, %cst_12 {dimension_numbers = #tpu.dot_dimension_numbers<[1], [0], [0], [1], [0, 0, 1, 1], [], []>} : vector<16x16xbf16>, vector<16x8xbf16>, vector<16x8xf32> -> vector<16x8xf32>
    %c0_13 = arith.constant 0 : index
    %c0_14 = arith.constant 0 : index
    %21 = vector.load %arg6[%c0_13, %c0_14] : memref<1x8xf32, #tpu.memory_space<vmem>>, vector<1x8xf32>
    %22 = vector.broadcast %21 : vector<1x8xf32> to vector<16x8xf32>
    %23 = arith.addf %20, %22 : vector<16x8xf32>
    %c0_15 = arith.constant 0 : index
    %c0_16 = arith.constant 0 : index
    %24 = vector.load %arg8[%c0_15, %c0_16] : memref<16x8xf32, #tpu.memory_space<vmem>>, vector<16x8xf32>
    tpu.vector_store %arg8[%c0_15, %c0_16], %23 {strides = array<i32>} : memref<16x8xf32, #tpu.memory_space<vmem>>, vector<16x8xf32>,
    %c16_i32 = arith.constant 16 : i32
    %25 = arith.muli %arg0, %c16_i32 : i32
    %26 = tpu.iota {dimensions = array<i32: 0>} : vector<16x1xi32>
    %27 = vector.broadcast %25 : i32 to vector<16x1xi32>
    %28 = arith.addi %27, %26 : vector<16x1xi32>
    %c16_i32_17 = arith.constant 16 : i32
    %29 = vector.broadcast %c16_i32_17 : i32 to vector<16x1xi32>
    %30 = arith.cmpi slt, %28, %29 : vector<16x1xi32>
    %31 = arith.subf %23, %0 : vector<16x8xf32>
    %cst_18 = arith.constant 0.000000e+00 : f32
    %32 = vector.shape_cast %30 : vector<16x1xi1> to vector<16x1xi1>
    %33 = vector.broadcast %32 : vector<16x1xi1> to vector<16x8xi1>
    %34 = vector.broadcast %cst_18 : f32 to vector<16x8xf32>
    %35 = arith.select %33, %31, %34 : vector<16x8xi1>, vector<16x8xf32>
    %36 = arith.mulf %35, %35 : vector<16x8xf32>
    %37 = vector.shape_cast %36 : vector<16x8xf32> to vector<1x16x8xf32>
    %cst_19 = arith.constant dense<0.000000e+00> : vector<1xf32>
    %38 = vector.multi_reduction <add>, %37, %cst_19 [1, 2] : vector<1x16x8xf32> to vector<1xf32>
    %39 = vector.shape_cast %38 : vector<1xf32> to vector<1x1x1xf32>
    %40 = vector.extract %39[0, 0, 0] : f32 from vector<1x1x1xf32>
    %41 = arith.mulf %11, %11 : vector<16x16xf32>
    %42 = arith.mulf %7, %7 : vector<16x16xf32>
    %43 = arith.addf %41, %42 : vector<16x16xf32>
    %cst_20 = arith.constant 1.000000e+00 : f32
    %44 = vector.broadcast %cst_20 : f32 to vector<16x16xf32>
    %45 = arith.subf %43, %44 : vector<16x16xf32>
    %46 = arith.subf %45, %8 : vector<16x16xf32>
    %cst_21 = arith.constant 5.000000e-01 : f32
    %47 = vector.broadcast %cst_21 : f32 to vector<16x16xf32>
    %48 = arith.mulf %47, %46 : vector<16x16xf32>
    %cst_22 = arith.constant 0.000000e+00 : f32
    %49 = vector.shape_cast %30 : vector<16x1xi1> to vector<16x1xi1>
    %50 = vector.broadcast %49 : vector<16x1xi1> to vector<16x16xi1>
    %51 = vector.broadcast %cst_22 : f32 to vector<16x16xf32>
    %52 = arith.select %50, %48, %51 : vector<16x16xi1>, vector<16x16xf32>
    %53 = vector.shape_cast %52 : vector<16x16xf32> to vector<1x16x16xf32>
    %cst_23 = arith.constant dense<0.000000e+00> : vector<1xf32>
    %54 = vector.multi_reduction <add>, %53, %cst_23 [1, 2] : vector<1x16x16xf32> to vector<1xf32>
    %55 = vector.shape_cast %54 : vector<1xf32> to vector<1x1x1xf32>
    %56 = vector.extract %55[0, 0, 0] : f32 from vector<1x1x1xf32>
    %57 = vector.broadcast %40 : f32 to vector<1x8x128xf32>
    %c0_24 = arith.constant 0 : index
    %c0_25 = arith.constant 0 : index
    %c0_26 = arith.constant 0 : index
    %58 = vector.load %arg9[%c0_24, %c0_25, %c0_26] : memref<1x8x128xf32, #tpu.memory_space<vmem>>, vector<1x8x128xf32>
    tpu.vector_store %arg9[%c0_24, %c0_25, %c0_26], %57 {strides = array<i32>} : memref<1x8x128xf32, #tpu.memory_space<vmem>>, vector<1x8x128xf32>,
    %59 = vector.broadcast %56 : f32 to vector<1x8x128xf32>
    %c0_27 = arith.constant 0 : index
    %c0_28 = arith.constant 0 : index
    %c0_29 = arith.constant 0 : index
    %60 = vector.load %arg10[%c0_27, %c0_28, %c0_29] : memref<1x8x128xf32, #tpu.memory_space<vmem>>, vector<1x8x128xf32>
    tpu.vector_store %arg10[%c0_27, %c0_28, %c0_29], %59 {strides = array<i32>} : memref<1x8x128xf32, #tpu.memory_space<vmem>>, vector<1x8x128xf32>,
    return
  }
  func.func @transform_0(%arg0: i32) -> (i32, i32) {
    %c0_i32 = arith.constant 0 : i32
    %c0_i32_0 = arith.constant 0 : i32
    return %arg0, %c0_i32 : i32, i32
  }
  func.func @transform_1(%arg0: i32) -> (i32, i32) {
    %c0_i32 = arith.constant 0 : i32
    %c0_i32_0 = arith.constant 0 : i32
    return %arg0, %c0_i32 : i32, i32
  }
  func.func @transform_2(%arg0: i32) -> (i32, i32) {
    %c0_i32 = arith.constant 0 : i32
    %c0_i32_0 = arith.constant 0 : i32
    %c0_i32_1 = arith.constant 0 : i32
    return %c0_i32, %c0_i32_0 : i32, i32
  }
  func.func @transform_3(%arg0: i32) -> (i32, i32) {
    %c0_i32 = arith.constant 0 : i32
    %c0_i32_0 = arith.constant 0 : i32
    %c0_i32_1 = arith.constant 0 : i32
    return %c0_i32, %c0_i32_0 : i32, i32
  }
  func.func @transform_4(%arg0: i32) -> (i32, i32) {
    %c0_i32 = arith.constant 0 : i32
    %c0_i32_0 = arith.constant 0 : i32
    %c0_i32_1 = arith.constant 0 : i32
    return %c0_i32, %c0_i32_0 : i32, i32
  }
  func.func @transform_5(%arg0: i32) -> (i32, i32) {
    %c0_i32 = arith.constant 0 : i32
    %c0_i32_0 = arith.constant 0 : i32
    %c0_i32_1 = arith.constant 0 : i32
    return %c0_i32, %c0_i32_0 : i32, i32
  }
  func.func @transform_6(%arg0: i32) -> (i32, i32) {
    %c0_i32 = arith.constant 0 : i32
    %c0_i32_0 = arith.constant 0 : i32
    %c0_i32_1 = arith.constant 0 : i32
    return %c0_i32, %c0_i32_0 : i32, i32
  }
  func.func @transform_7(%arg0: i32) -> (i32, i32) {
    %c0_i32 = arith.constant 0 : i32
    %c0_i32_0 = arith.constant 0 : i32
    return %arg0, %c0_i32 : i32, i32
  }
  func.func @transform_8(%arg0: i32) -> (i32, i32, i32) {
    %c0_i32 = arith.constant 0 : i32
    %c0_i32_0 = arith.constant 0 : i32
    %c0_i32_1 = arith.constant 0 : i32
    return %arg0, %c0_i32, %c0_i32_0 : i32, i32, i32
  }
  func.func @transform_9(%arg0: i32) -> (i32, i32, i32) {
    %c0_i32 = arith.constant 0 : i32
    %c0_i32_0 = arith.constant 0 : i32
    %c0_i32_1 = arith.constant 0 : i32
    return %arg0, %c0_i32, %c0_i32_0 : i32, i32, i32
  }
}

module attributes {stable_mosaic.version = 11 : i64} {
  func.func @_fused_branch_kernel(%arg0: i32, %arg1: memref<16x16xf32, #tpu.memory_space<vmem>>, %arg2: memref<16x16xf32, #tpu.memory_space<vmem>>, %arg3: memref<16x32xbf16, #tpu.memory_space<vmem>>, %arg4: memref<1x32xf32, #tpu.memory_space<vmem>>, %arg5: memref<16x16xbf16, #tpu.memory_space<vmem>>, %arg6: memref<1x16xf32, #tpu.memory_space<vmem>>, %arg7: memref<1x16xf32, #tpu.memory_space<vmem>>, %arg8: memref<16x16xf32, #tpu.memory_space<vmem>>, %arg9: memref<1x8x128xf32, #tpu.memory_space<vmem>>, %arg10: memref<1x8x128xf32, #tpu.memory_space<vmem>>) attributes {dimension_semantics = [#tpu.dimension_semantics<parallel>], iteration_bounds = array<i64: 1>, scalar_prefetch = 0 : i64, scratch_operands = 0 : i64, tpu.core_type = #tpu.core_type<tc>, window_params = [{transform_indices = @transform_0, window_bounds = array<i64: 16, 16>}, {transform_indices = @transform_1, window_bounds = array<i64: 16, 16>}, {pipeline_mode = #tpu.pipeline_mode<synchronous>, transform_indices = @transform_2, window_bounds = array<i64: 16, 32>}, {pipeline_mode = #tpu.pipeline_mode<synchronous>, transform_indices = @transform_3, window_bounds = array<i64: 1, 32>}, {pipeline_mode = #tpu.pipeline_mode<synchronous>, transform_indices = @transform_4, window_bounds = array<i64: 16, 16>}, {pipeline_mode = #tpu.pipeline_mode<synchronous>, transform_indices = @transform_5, window_bounds = array<i64: 1, 16>}, {pipeline_mode = #tpu.pipeline_mode<synchronous>, transform_indices = @transform_6, window_bounds = array<i64: 1, 16>}, {transform_indices = @transform_7, window_bounds = array<i64: 16, 16>}, {transform_indices = @transform_8, window_bounds = array<i64: 1, 8, 128>}, {transform_indices = @transform_9, window_bounds = array<i64: 1, 8, 128>}]} {
    %c0 = arith.constant 0 : index
    %c0_0 = arith.constant 0 : index
    %0 = vector.load %arg1[%c0, %c0_0] : memref<16x16xf32, #tpu.memory_space<vmem>>, vector<16x16xf32>
    %1 = arith.truncf %0 : vector<16x16xf32> to vector<16x16xbf16>
    %c0_1 = arith.constant 0 : index
    %c0_2 = arith.constant 0 : index
    %2 = vector.load %arg3[%c0_1, %c0_2] : memref<16x32xbf16, #tpu.memory_space<vmem>>, vector<16x32xbf16>
    %cst = arith.constant dense<0.000000e+00> : vector<16x32xf32>
    %3 = tpu.matmul %1, %2, %cst {dimension_numbers = #tpu.dot_dimension_numbers<[1], [0], [0], [1], [0, 0, 1, 1], [], []>} : vector<16x16xbf16>, vector<16x32xbf16>, vector<16x32xf32> -> vector<16x32xf32>
    %c0_3 = arith.constant 0 : index
    %c0_4 = arith.constant 0 : index
    %4 = vector.load %arg4[%c0_3, %c0_4] : memref<1x32xf32, #tpu.memory_space<vmem>>, vector<1x32xf32>
    %5 = vector.broadcast %4 : vector<1x32xf32> to vector<16x32xf32>
    %6 = arith.addf %3, %5 : vector<16x32xf32>
    %7 = vector.extract_strided_slice %6 {offsets = [0, 0], sizes = [16, 16], strides = [1, 1]} : vector<16x32xf32> to vector<16x16xf32>
    %8 = vector.extract_strided_slice %6 {offsets = [0, 16], sizes = [16, 16], strides = [1, 1]} : vector<16x32xf32> to vector<16x16xf32>
    %cst_5 = arith.constant 5.000000e-01 : f32
    %9 = vector.broadcast %cst_5 : f32 to vector<16x16xf32>
    %10 = arith.mulf %9, %8 : vector<16x16xf32>
    %11 = math.exp %10 : vector<16x16xf32>
    %c0_6 = arith.constant 0 : index
    %c0_7 = arith.constant 0 : index
    %12 = vector.load %arg2[%c0_6, %c0_7] : memref<16x16xf32, #tpu.memory_space<vmem>>, vector<16x16xf32>
    %13 = arith.mulf %11, %12 : vector<16x16xf32>
    %14 = arith.addf %7, %13 : vector<16x16xf32>
    %c0_8 = arith.constant 0 : index
    %c0_9 = arith.constant 0 : index
    %15 = vector.load %arg7[%c0_8, %c0_9] : memref<1x16xf32, #tpu.memory_space<vmem>>, vector<1x16xf32>
    %16 = vector.broadcast %15 : vector<1x16xf32> to vector<16x16xf32>
    %17 = arith.addf %14, %16 : vector<16x16xf32>
    %18 = arith.truncf %17 : vector<16x16xf32> to vector<16x16xbf16>
    %c0_10 = arith.constant 0 : index
    %c0_11 = arith.constant 0 : index
    %19 = vector.load %arg5[%c0_10, %c0_11] : memref<16x16xbf16, #tpu.memory_space<vmem>>, vector<16x16xbf16>
    %cst_12 = arith.constant dense<0.000000e+00> : vector<16x16xf32>
    %20 = tpu.matmul %18, %19, %cst_12 {dimension_numbers = #tpu.dot_dimension_numbers<[1], [0], [0], [1], [0, 0, 1, 1], [], []>} : vector<16x16xbf16>, vector<16x16xbf16>, vector<16x16xf32> -> vector<16x16xf32>
    %c0_13 = arith.constant 0 : index
    %c0_14 = arith.constant 0 : index
    %21 = vector.load %arg6[%c0_13, %c0_14] : memref<1x16xf32, #tpu.memory_space<vmem>>, vector<1x16xf32>
    %22 = vector.broadcast %21 : vector<1x16xf32> to vector<16x16xf32>
    %23 = arith.addf %20, %22 : vector<16x16xf32>
    %c0_15 = arith.constant 0 : index
    %c0_16 = arith.constant 0 : index
    %24 = vector.load %arg8[%c0_15, %c0_16] : memref<16x16xf32, #tpu.memory_space<vmem>>, vector<16x16xf32>
    tpu.vector_store %arg8[%c0_15, %c0_16], %23 {strides = array<i32>} : memref<16x16xf32, #tpu.memory_space<vmem>>, vector<16x16xf32>,
    %c16_i32 = arith.constant 16 : i32
    %25 = arith.muli %arg0, %c16_i32 : i32
    %26 = tpu.iota {dimensions = array<i32: 0>} : vector<16x1xi32>
    %27 = vector.broadcast %25 : i32 to vector<16x1xi32>
    %28 = arith.addi %27, %26 : vector<16x1xi32>
    %c16_i32_17 = arith.constant 16 : i32
    %29 = vector.broadcast %c16_i32_17 : i32 to vector<16x1xi32>
    %30 = arith.cmpi slt, %28, %29 : vector<16x1xi32>
    %31 = arith.subf %23, %0 : vector<16x16xf32>
    %cst_18 = arith.constant 0.000000e+00 : f32
    %32 = vector.shape_cast %30 : vector<16x1xi1> to vector<16x1xi1>
    %33 = vector.broadcast %32 : vector<16x1xi1> to vector<16x16xi1>
    %34 = vector.broadcast %cst_18 : f32 to vector<16x16xf32>
    %35 = arith.select %33, %31, %34 : vector<16x16xi1>, vector<16x16xf32>
    %36 = arith.mulf %35, %35 : vector<16x16xf32>
    %37 = vector.shape_cast %36 : vector<16x16xf32> to vector<1x16x16xf32>
    %cst_19 = arith.constant dense<0.000000e+00> : vector<1xf32>
    %38 = vector.multi_reduction <add>, %37, %cst_19 [1, 2] : vector<1x16x16xf32> to vector<1xf32>
    %39 = vector.shape_cast %38 : vector<1xf32> to vector<1x1x1xf32>
    %40 = vector.extract %39[0, 0, 0] : f32 from vector<1x1x1xf32>
    %41 = arith.mulf %11, %11 : vector<16x16xf32>
    %42 = arith.mulf %7, %7 : vector<16x16xf32>
    %43 = arith.addf %41, %42 : vector<16x16xf32>
    %cst_20 = arith.constant 1.000000e+00 : f32
    %44 = vector.broadcast %cst_20 : f32 to vector<16x16xf32>
    %45 = arith.subf %43, %44 : vector<16x16xf32>
    %46 = arith.subf %45, %8 : vector<16x16xf32>
    %cst_21 = arith.constant 5.000000e-01 : f32
    %47 = vector.broadcast %cst_21 : f32 to vector<16x16xf32>
    %48 = arith.mulf %47, %46 : vector<16x16xf32>
    %cst_22 = arith.constant 0.000000e+00 : f32
    %49 = vector.shape_cast %30 : vector<16x1xi1> to vector<16x1xi1>
    %50 = vector.broadcast %49 : vector<16x1xi1> to vector<16x16xi1>
    %51 = vector.broadcast %cst_22 : f32 to vector<16x16xf32>
    %52 = arith.select %50, %48, %51 : vector<16x16xi1>, vector<16x16xf32>
    %53 = vector.shape_cast %52 : vector<16x16xf32> to vector<1x16x16xf32>
    %cst_23 = arith.constant dense<0.000000e+00> : vector<1xf32>
    %54 = vector.multi_reduction <add>, %53, %cst_23 [1, 2] : vector<1x16x16xf32> to vector<1xf32>
    %55 = vector.shape_cast %54 : vector<1xf32> to vector<1x1x1xf32>
    %56 = vector.extract %55[0, 0, 0] : f32 from vector<1x1x1xf32>
    %57 = vector.broadcast %40 : f32 to vector<1x8x128xf32>
    %c0_24 = arith.constant 0 : index
    %c0_25 = arith.constant 0 : index
    %c0_26 = arith.constant 0 : index
    %58 = vector.load %arg9[%c0_24, %c0_25, %c0_26] : memref<1x8x128xf32, #tpu.memory_space<vmem>>, vector<1x8x128xf32>
    tpu.vector_store %arg9[%c0_24, %c0_25, %c0_26], %57 {strides = array<i32>} : memref<1x8x128xf32, #tpu.memory_space<vmem>>, vector<1x8x128xf32>,
    %59 = vector.broadcast %56 : f32 to vector<1x8x128xf32>
    %c0_27 = arith.constant 0 : index
    %c0_28 = arith.constant 0 : index
    %c0_29 = arith.constant 0 : index
    %60 = vector.load %arg10[%c0_27, %c0_28, %c0_29] : memref<1x8x128xf32, #tpu.memory_space<vmem>>, vector<1x8x128xf32>
    tpu.vector_store %arg10[%c0_27, %c0_28, %c0_29], %59 {strides = array<i32>} : memref<1x8x128xf32, #tpu.memory_space<vmem>>, vector<1x8x128xf32>,
    return
  }
  func.func @transform_0(%arg0: i32) -> (i32, i32) {
    %c0_i32 = arith.constant 0 : i32
    %c0_i32_0 = arith.constant 0 : i32
    return %arg0, %c0_i32 : i32, i32
  }
  func.func @transform_1(%arg0: i32) -> (i32, i32) {
    %c0_i32 = arith.constant 0 : i32
    %c0_i32_0 = arith.constant 0 : i32
    return %arg0, %c0_i32 : i32, i32
  }
  func.func @transform_2(%arg0: i32) -> (i32, i32) {
    %c0_i32 = arith.constant 0 : i32
    %c0_i32_0 = arith.constant 0 : i32
    %c0_i32_1 = arith.constant 0 : i32
    return %c0_i32, %c0_i32_0 : i32, i32
  }
  func.func @transform_3(%arg0: i32) -> (i32, i32) {
    %c0_i32 = arith.constant 0 : i32
    %c0_i32_0 = arith.constant 0 : i32
    %c0_i32_1 = arith.constant 0 : i32
    return %c0_i32, %c0_i32_0 : i32, i32
  }
  func.func @transform_4(%arg0: i32) -> (i32, i32) {
    %c0_i32 = arith.constant 0 : i32
    %c0_i32_0 = arith.constant 0 : i32
    %c0_i32_1 = arith.constant 0 : i32
    return %c0_i32, %c0_i32_0 : i32, i32
  }
  func.func @transform_5(%arg0: i32) -> (i32, i32) {
    %c0_i32 = arith.constant 0 : i32
    %c0_i32_0 = arith.constant 0 : i32
    %c0_i32_1 = arith.constant 0 : i32
    return %c0_i32, %c0_i32_0 : i32, i32
  }
  func.func @transform_6(%arg0: i32) -> (i32, i32) {
    %c0_i32 = arith.constant 0 : i32
    %c0_i32_0 = arith.constant 0 : i32
    %c0_i32_1 = arith.constant 0 : i32
    return %c0_i32, %c0_i32_0 : i32, i32
  }
  func.func @transform_7(%arg0: i32) -> (i32, i32) {
    %c0_i32 = arith.constant 0 : i32
    %c0_i32_0 = arith.constant 0 : i32
    return %arg0, %c0_i32 : i32, i32
  }
  func.func @transform_8(%arg0: i32) -> (i32, i32, i32) {
    %c0_i32 = arith.constant 0 : i32
    %c0_i32_0 = arith.constant 0 : i32
    %c0_i32_1 = arith.constant 0 : i32
    return %arg0, %c0_i32, %c0_i32_0 : i32, i32, i32
  }
  func.func @transform_9(%arg0: i32) -> (i32, i32, i32) {
    %c0_i32 = arith.constant 0 : i32
    %c0_i32_0 = arith.constant 0 : i32
    %c0_i32_1 = arith.constant 0 : i32
    return %arg0, %c0_i32, %c0_i32_0 : i32, i32, i32
  }
}

</mosaic_0001>

<bundles_post_ra>
// kernel: _forward_fn.2
= control target key start
LH: loop header
LB: loop body
LE: loop exit
PB: predicated region body
PF: predicated region fallthrough
CT: control target
= control target key end

     0   :  { %vm46_vm0 = vcmask 1043456   ;;  %v356_v2 = vmov 0.0   ;;  %vm357_vm1 = vmmov 0   ;;  %vm42_vm2 = vcmask 64512   ;;  %s475_s0 = inlined_call_operand.vmem [shape: f32[16,8], index: 0, kind: input, shape index: {}]   ;;  %s476_s1 = inlined_call_operand.vmem [shape: f32[16,16], index: 1, kind: input, shape index: {}]   ;;  %s477_s2 = inlined_call_operand.vmem [shape: bf16[8,32], index: 2, kind: input, shape index: {}]   ;;  %s478_s3 = inlined_call_operand.vmem [shape: f32[1,32], index: 3, kind: input, shape index: {}]   ;;  %s479_s4 = inlined_call_operand.vmem [shape: bf16[16,8], index: 4, kind: input, shape index: {}]   ;;  %s480_s5 = inlined_call_operand.vmem [shape: f32[1,8], index: 5, kind: input, shape index: {}]   ;;  %s481_s6 = inlined_call_operand.vmem [shape: f32[1,16], index: 6, kind: input, shape index: {}]   ;;  %s482_s7 = inlined_call_operand.hbm [shape: f32[16,8], index: 7, kind: output, shape index: {0}]   ;;  %s483_s8 = inlined_call_operand.vmem [shape: f32[1,8,128], index: 8, kind: output, shape index: {1}]   ;;  %s484_s9 = inlined_call_operand.vmem [shape: f32[1,8,128], index: 9, kind: output, shape index: {2}]  }
   0x1   :  { %v34_v0 = vld [vmem:[%s477_s2] sm:$0xf]  ;;  %304 = vmatprep.subr.bf16.mxu0 %v356_v2  ;;  %306 = vmatprep.mubr.msk.bf16.mxu0 %vm357_vm1, %v356_v2  ;;  %v424_v4 = vld [vmem:[%s475_s0 + $0x8] sm:$0xff]  ;;  %s358_s2 = smov 16  }
   0x2   :  { %v419_v1 = vld [vmem:[%s475_s0] sm:$0xff]  ;;  %v48_v3 = vsel %vm46_vm0, %v34_v0, 0  ;;  %v98_v7 = vld [vmem:[%s476_s1 + $0x8] sm:$0xff]  ;;  %310 = vmatprep.subr.bf16.mxu1 %v356_v2  ;;  %312 = vmatprep.mubr.msk.bf16.mxu1 %vm357_vm1, %v356_v2 }
   0x3   :  { %v97_v5 = vld [vmem:[%s476_s1] sm:$0xff]  ;;  %305 = vmatpush3.bf16.msra.mxu0 %v48_v3  ;;  %v33_v6 = vpack.c.bf16 %v424_v4, %v419_v1 }
   0x4   :  { %101 = vrot.lane.b32.xlu0 %v97_v5, %s358_s2 }
   0x5   :  { %15 = vsyncpa [#allocation3], 0  ;;  %v292_v8 = vld [vmem:[%s478_s3] ss:$0 sm:$0xff]  ;;  %s359_s3 = smov 112   ;;  %vm144_vm3 = vcmask 130048  }
   0x6   :  { %307 = vmatmul.mubr.msk.bf16.vlgmr.msra.gmra.mrb[0].mxu0 %vm42_vm2, %v33_v6  ;;  %v327_v20 = vld [vmem:[%s479_s4] sm:$0xff]  }
   0x7   :  { %311 = vmatpush3.bf16.msra.mxu1 %v327_v20  ;;  %v294_v36 = vld [vmem:[%s481_s6] ss:$0 sm:$0xff] }
   0x8   :  { %103 = vrot.lane.b32.xlu0 %v98_v7, %s358_s2  ;;  %v295_v53 = vld [vmem:[%s480_s5] ss:$0 sm:$0xff]  ;;  %s360_s5 = smov [#allocation2]  }
   0x9   :  { %s273_s23 = sshll.u32 %s360_s5, 4  ;;  %s274_s23 = int_to_ptr.vmem [resolvable:$true] %s273_s23 }
   0xa   :  { %s332_s24 = scalar_lea.vmem %s274_s23, 256  ;;  %p337_p1 = scmp.lt.s32.totalorder %s274_s23, %s274_s23 }
   0xb   :  { %p333_p0 = scmp.ne.s32.totalorder %s274_s23, %s332_s24  ;;  %p338_p2 = scmp.lt.s32.totalorder %s332_s24, %s332_s24 }
   0xd   :  { %p339_p3 = por %p338_p2, %p337_p1 }
   0xf   :  { %p340_p4 = pnand %p339_p3, %p333_p0 }
  0x76   :  { %v102_v21 = vpop.permute.xlu0 %101 }
  0x7a   :  { %v104_v25 = vpop.permute.xlu0 %103 }
  0xd9   :  { %v84_v9 = vpop.f32.mrb[0].mxu0 }
  0xda   :  { %v85_v10 = vadd.f32 %v292_v8, %v84_v9  ;;  %v308_v11 = vpop.f32.mrb[1].mxu0 }
  0xdb   :  { %v87_v12 = vpop.f32.mrb[2].mxu0 }
  0xdc   :  { %v91_v13 = vmul.f32 0.5, %v85_v10  ;;  %v88_v14 = vadd.f32 %v292_v8, %v87_v12  ;;  %v309_v15 = vpop.f32.mrb[3].mxu0  ;;  %v224_v16 = vmul.f32 %v85_v10, %v85_v10 }
  0xde   :  { %v93_v17 = vmul.f32 1.442695, %v91_v13  ;;  %v92_v18 = vmul.f32 0.5, %v88_v14  ;;  %228 = vrot.lane.b32.xlu0 %v224_v16, %s358_s2  ;;  %v225_v27 = vmul.f32 %v88_v14, %v88_v14 }
  0xe0   :  { %328 = vpow2.f32 %v93_v17  ;;  %v95_v19 = vmul.f32 1.442695, %v92_v18 }
  0xe2   :  { %330 = vpow2.f32 %v95_v19 }
  0xea   :  { %v329_v22 = vpop.eup %328 }
  0xeb   :  { %v107_v23 = vmul.f32 %v329_v22, %v102_v21  ;;  %v222_v28 = vmul.f32 %v329_v22, %v329_v22 }
  0xec   :  { %v331_v24 = vpop.eup %330 }
  0xed   :  { %111 = vrot.lane.b32.xlu1 %v107_v23, %s359_s3  ;;  %v108_v26 = vmul.f32 %v331_v24, %v104_v25  ;;  %v223_v41 = vmul.f32 %v331_v24, %v331_v24 }
  0xf1   :  { %113 = vrot.lane.b32.xlu1 %v108_v26, %s359_s3 }
  0xf5   :  { %230 = vrot.lane.b32.xlu1 %v225_v27, %s358_s2 }
 0x150   :  { %v229_v29 = vpop.permute.xlu0 %228 }
 0x151   :  { %v234_v30 = vadd.f32 %v229_v29, %v222_v28 }
 0x153   :  { %v298_v31 = vadd.f32 -1.0, %v234_v30 }
 0x155   :  { %v238_v32 = vsub.f32 %v298_v31, %v85_v10 }
 0x157   :  { %v240_v33 = vmul.f32 0.5, %v238_v32 }
 0x159   :  { %246 = vrot.lane.b32.xlu0 %v240_v33, %s359_s3 }
 0x15f   :  { %v112_v34 = vpop.permute.xlu1 %111 }
 0x160   :  { %v117_v35 = vadd.f32 %v112_v34, %v85_v10 }
 0x162   :  { %v126_v39 = vadd.f32 %v294_v36, %v117_v35 }
 0x163   :  { %v114_v37 = vpop.permute.xlu1 %113 }
 0x164   :  { %v118_v38 = vadd.f32 %v114_v37, %v88_v14 }
 0x166   :  { %v127_v40 = vadd.f32 %v294_v36, %v118_v38 }
 0x167   :  { %v231_v42 = vpop.permute.xlu1 %230 }
 0x168   :  { %v128_v43 = vpack.c.bf16 %v127_v40, %v126_v39  ;;  %v235_v44 = vadd.f32 %v231_v42, %v223_v41 }
 0x16a   :  { %v299_v45 = vadd.f32 -1.0, %v235_v44  ;;  %313 = vmatmul.mubr.msk.bf16.vlgmr.msra.gmra.mrb[0].mxu1 %vm144_vm3, %v128_v43 }
 0x16c   :  { %v239_v46 = vsub.f32 %v299_v45, %v88_v14 }
 0x16e   :  { %v241_v47 = vmul.f32 0.5, %v239_v46 }
 0x170   :  { %248 = vrot.lane.b32.xlu1 %v241_v47, %s359_s3 }
 0x1cb   :  { %v247_v48 = vpop.permute.xlu0 %246 }
 0x1cc   :  { %v252_v50 = vsel %vm144_vm3, %v247_v48, 0.0 }
 0x1e2   :  { %v249_v49 = vpop.permute.xlu1 %248 }
 0x1e3   :  { %v253_v51 = vsel %vm144_vm3, %v249_v49, 0.0 }
 0x1e4   :  { %v254_v52 = vadd.f32 %v253_v51, %v252_v50 }
 0x1e6   :  { %255 = vadd.xlane.f32.xlu1 %v254_v52 }
 0x23d   :  { %v182_v54 = vpop.f32.mrb[0].mxu1 }
 0x23e   :  { %v183_v55 = vadd.f32 %v295_v53, %v182_v54  ;;  %v314_v56 = vpop.f32.mrb[1].mxu1 }
 0x23f   :  { %v185_v57 = vpop.f32.mrb[2].mxu1 }
 0x240   :  { %189 = vst.msk [vmem:[#allocation2] sm:$0xff] %vm42_vm2, %v183_v55  ;;  %v200_v58 = vsub.f32 %v183_v55, %v419_v1  ;;  %v186_v59 = vadd.f32 %v295_v53, %v185_v57  ;;  %v315_v60 = vpop.f32.mrb[3].mxu1 }
 0x242   :  { %v208_v61 = vmul.f32 %v200_v58, %v200_v58  ;;  %190 = vst.msk [vmem:[#allocation2 + $0x8] sm:$0xff] %vm42_vm2, %v186_v59  ;;  %v201_v62 = vsub.f32 %v186_v59, %v424_v4 }
 0x244   :  { %v209_v63 = vmul.f32 %v201_v62, %v201_v62  ;;  %v210_v0 = vsel %vm42_vm2, %v208_v61, 0.0 }
 0x246   :  { %v211_v2 = vsel %vm42_vm2, %v209_v63, 0.0 }
 0x247   :  { %v212_v3 = vadd.f32 %v211_v2, %v210_v0 }
 0x249   :  { %213 = vadd.xlane.f32.xlu0 %v212_v3 }
 0x24a   :  { %343 = shalt.err (!%p340_p4)
}
 0x24b   :  { %s344_s27 = scalar_lea.hbm %s482_s7, 256 }
 0x24c   :  { %p345_p5 = scmp.ne.s32.totalorder %s482_s7, %s344_s27  ;;  %p348_p6 = scmp.lt.u32.totalorder %s344_s27, %s482_s7 }
 0x24e   :  { %p350_p7 = pnand %p348_p6, %p345_p5 }
 0x250   :  { %353 = shalt.err (!%p350_p7)
}
 0x251   :  { %s361_s11 = smov 128   ;;  %s362_s12 = smov 8  }
 0x252   :  { %279 = dma.vmem_to_hbm [thread:$0]  %s274_s23, 256, %s482_s7, [#allocation3], %s361_s11, %s361_s11, %s362_s12  }
 0x273   :  { %v256_v1 = vpop.xlane.xlu1 %255 }
 0x274   :  { %v257_v4 = vrot.slane %v256_v1, 4 }
 0x276   :  { %v258_v5 = vadd.f32 %v257_v4, %v256_v1 }
 0x278   :  { %v259_v6 = vrot.slane %v258_v5, 2 }
 0x27a   :  { %v260_v10 = vadd.f32 %v259_v6, %v258_v5 }
 0x27c   :  { %v261_v13 = vrot.slane %v260_v10, 1 }
 0x27e   :  { %v262_v16 = vadd.f32 %v261_v13, %v260_v10 }
 0x2d6   :  { %v214_v7 = vpop.xlane.xlu0 %213 }
 0x2d7   :  { %v215_v8 = vrot.slane %v214_v7, 4 }
 0x2d9   :  { %v216_v9 = vadd.f32 %v215_v8, %v214_v7 }
 0x2db   :  { %v217_v11 = vrot.slane %v216_v9, 2 }
 0x2dd   :  { %v218_v12 = vadd.f32 %v217_v11, %v216_v9 }
 0x2df   :  { %v219_v14 = vrot.slane %v218_v12, 1 }
 0x2e1   :  { %v220_v15 = vadd.f32 %v219_v14, %v218_v12 }
 0x2e3   :  { %316 = vpush %v220_v15 }
 0x2e4   :  { %318 = vpush %v262_v16 }
 0x314   :  { %s317_s15 = spop %316 }
 0x315   :  { %v264_v17 = vstv %s317_s15  ;;  %s319_s16 = spop %318 }
 0x316   :  { %265 = vst [vmem:[%s483_s8] sm:$0xff] %v264_v17  ;;  %v266_v18 = vstv %s319_s16 }
 0x317   :  { %267 = vst [vmem:[%s484_s9] sm:$0xff] %v266_v18 }
 0x318   :  { %354 = dma.done.wait [#allocation3], 256  }
 0x319   :  { %355 = vsyncadd [#allocation3], 4294967040 }
 0x31a   :  { %291 = vsyncpa [#allocation3], 1 }

// kernel: _forward_fn.3
= control target key start
LH: loop header
LB: loop body
LE: loop exit
PB: predicated region body
PF: predicated region fallthrough
CT: control target
= control target key end

     0   :  { %v360_v1 = vmov 0.0   ;;  %vm361_vm0 = vmmov 0   ;;  %vm49_vm1 = vcmask 130048   ;;  %s482_s0 = inlined_call_operand.vmem [shape: f32[16,16], index: 0, kind: input, shape index: {}]   ;;  %s483_s1 = inlined_call_operand.vmem [shape: f32[16,16], index: 1, kind: input, shape index: {}]   ;;  %s484_s2 = inlined_call_operand.vmem [shape: bf16[16,32], index: 2, kind: input, shape index: {}]   ;;  %s485_s3 = inlined_call_operand.vmem [shape: f32[1,32], index: 3, kind: input, shape index: {}]   ;;  %s486_s4 = inlined_call_operand.vmem [shape: bf16[16,16], index: 4, kind: input, shape index: {}]   ;;  %s487_s5 = inlined_call_operand.vmem [shape: f32[1,16], index: 5, kind: input, shape index: {}]   ;;  %s488_s6 = inlined_call_operand.vmem [shape: f32[1,16], index: 6, kind: input, shape index: {}]   ;;  %s489_s7 = inlined_call_operand.hbm [shape: f32[16,16], index: 7, kind: output, shape index: {0}]   ;;  %s490_s8 = inlined_call_operand.vmem [shape: f32[1,8,128], index: 8, kind: output, shape index: {1}]   ;;  %s491_s9 = inlined_call_operand.vmem [shape: f32[1,8,128], index: 9, kind: output, shape index: {2}]  }
   0x1   :  { %v330_v0 = vld [vmem:[%s484_s2] sm:$0xff]   ;;  %307 = vmatprep.subr.bf16.mxu0 %v360_v1  ;;  %v428_v3 = vld [vmem:[%s482_s0 + $0x8] sm:$0xff]  ;;  %313 = vmatprep.subr.bf16.mxu1 %v360_v1  ;;  %s362_s2 = smov 16  }
   0x2   :  { %v423_v2 = vld [vmem:[%s482_s0] sm:$0xff]  ;;  %308 = vmatpush3.bf16.msra.mxu0 %v330_v0  ;;  %309 = vmatprep.mubr.msk.bf16.mxu0 %vm361_vm0, %v360_v1 }
   0x3   :  { %v100_v4 = vld [vmem:[%s483_s1] sm:$0xff]  ;;  %v33_v5 = vpack.c.bf16 %v428_v3, %v423_v2  ;;  %315 = vmatprep.mubr.msk.bf16.mxu1 %vm361_vm0, %v360_v1 }
   0x4   :  { %104 = vrot.lane.b32.xlu0 %v100_v4, %s362_s2 }
   0x5   :  { %15 = vsyncpa [#allocation3], 0  ;;  %v101_v6 = vld [vmem:[%s483_s1 + $0x8] sm:$0xff]  ;;  %310 = vmatmul.mubr.msk.bf16.vlgmr.msra.gmra.mrb[0].mxu0 %vm49_vm1, %v33_v5  ;;  %v294_v7 = vld [vmem:[%s485_s3] ss:$0 sm:$0xff]  ;;  %s363_s3 = smov 112  }
   0x6   :  { %v331_v19 = vld [vmem:[%s486_s4] sm:$0xff]  }
   0x7   :  { %314 = vmatpush3.bf16.msra.mxu1 %v331_v19  ;;  %v297_v35 = vld [vmem:[%s488_s6] ss:$0 sm:$0xff] }
   0x8   :  { %106 = vrot.lane.b32.xlu0 %v101_v6, %s362_s2  ;;  %v298_v52 = vld [vmem:[%s487_s5] ss:$0 sm:$0xff]  ;;  %s364_s5 = smov [#allocation2]  }
   0x9   :  { %s275_s23 = sshll.u32 %s364_s5, 4  ;;  %s276_s23 = int_to_ptr.vmem [resolvable:$true] %s275_s23 }
   0xa   :  { %s336_s24 = scalar_lea.vmem %s276_s23, 256  ;;  %p341_p1 = scmp.lt.s32.totalorder %s276_s23, %s276_s23 }
   0xb   :  { %p337_p0 = scmp.ne.s32.totalorder %s276_s23, %s336_s24  ;;  %p342_p2 = scmp.lt.s32.totalorder %s336_s24, %s336_s24 }
   0xd   :  { %p343_p3 = por %p342_p2, %p341_p1 }
   0xf   :  { %p344_p4 = pnand %p343_p3, %p337_p0 }
  0x76   :  { %v105_v20 = vpop.permute.xlu0 %104 }
  0x7a   :  { %v107_v24 = vpop.permute.xlu0 %106 }
  0xd8   :  { %v87_v8 = vpop.f32.mrb[0].mxu0 }
  0xd9   :  { %v88_v9 = vadd.f32 %v294_v7, %v87_v8  ;;  %v311_v10 = vpop.f32.mrb[1].mxu0 }
  0xda   :  { %v90_v11 = vpop.f32.mrb[2].mxu0 }
  0xdb   :  { %v94_v12 = vmul.f32 0.5, %v88_v9  ;;  %v91_v13 = vadd.f32 %v294_v7, %v90_v11  ;;  %v312_v14 = vpop.f32.mrb[3].mxu0  ;;  %v226_v15 = vmul.f32 %v88_v9, %v88_v9 }
  0xdd   :  { %v96_v16 = vmul.f32 1.442695, %v94_v12  ;;  %v95_v17 = vmul.f32 0.5, %v91_v13  ;;  %230 = vrot.lane.b32.xlu0 %v226_v15, %s362_s2  ;;  %v227_v26 = vmul.f32 %v91_v13, %v91_v13 }
  0xdf   :  { %332 = vpow2.f32 %v96_v16  ;;  %v98_v18 = vmul.f32 1.442695, %v95_v17 }
  0xe1   :  { %334 = vpow2.f32 %v98_v18 }
  0xe9   :  { %v333_v21 = vpop.eup %332 }
  0xea   :  { %v110_v22 = vmul.f32 %v333_v21, %v105_v20  ;;  %v224_v27 = vmul.f32 %v333_v21, %v333_v21 }
  0xeb   :  { %v335_v23 = vpop.eup %334 }
  0xec   :  { %114 = vrot.lane.b32.xlu1 %v110_v22, %s363_s3  ;;  %v111_v25 = vmul.f32 %v335_v23, %v107_v24  ;;  %v225_v40 = vmul.f32 %v335_v23, %v335_v23 }
  0xf0   :  { %116 = vrot.lane.b32.xlu1 %v111_v25, %s363_s3 }
  0xf4   :  { %232 = vrot.lane.b32.xlu1 %v227_v26, %s362_s2 }
 0x14f   :  { %v231_v28 = vpop.permute.xlu0 %230 }
 0x150   :  { %v236_v29 = vadd.f32 %v231_v28, %v224_v27 }
 0x152   :  { %v301_v30 = vadd.f32 -1.0, %v236_v29 }
 0x154   :  { %v240_v31 = vsub.f32 %v301_v30, %v88_v9 }
 0x156   :  { %v242_v32 = vmul.f32 0.5, %v240_v31 }
 0x158   :  { %248 = vrot.lane.b32.xlu0 %v242_v32, %s363_s3 }
 0x15e   :  { %v115_v33 = vpop.permute.xlu1 %114 }
 0x15f   :  { %v120_v34 = vadd.f32 %v115_v33, %v88_v9 }
 0x161   :  { %v129_v38 = vadd.f32 %v297_v35, %v120_v34 }
 0x162   :  { %v117_v36 = vpop.permute.xlu1 %116 }
 0x163   :  { %v121_v37 = vadd.f32 %v117_v36, %v91_v13 }
 0x165   :  { %v130_v39 = vadd.f32 %v297_v35, %v121_v37 }
 0x166   :  { %v233_v41 = vpop.permute.xlu1 %232 }
 0x167   :  { %v131_v42 = vpack.c.bf16 %v130_v39, %v129_v38  ;;  %v237_v43 = vadd.f32 %v233_v41, %v225_v40 }
 0x169   :  { %v302_v44 = vadd.f32 -1.0, %v237_v43  ;;  %316 = vmatmul.mubr.msk.bf16.vlgmr.msra.gmra.mrb[0].mxu1 %vm49_vm1, %v131_v42 }
 0x16b   :  { %v241_v45 = vsub.f32 %v302_v44, %v91_v13 }
 0x16d   :  { %v243_v46 = vmul.f32 0.5, %v241_v45 }
 0x16f   :  { %250 = vrot.lane.b32.xlu1 %v243_v46, %s363_s3 }
 0x1ca   :  { %v249_v47 = vpop.permute.xlu0 %248 }
 0x1cb   :  { %v254_v49 = vsel %vm49_vm1, %v249_v47, 0.0 }
 0x1e1   :  { %v251_v48 = vpop.permute.xlu1 %250 }
 0x1e2   :  { %v255_v50 = vsel %vm49_vm1, %v251_v48, 0.0 }
 0x1e3   :  { %v256_v51 = vadd.f32 %v255_v50, %v254_v49 }
 0x1e5   :  { %257 = vadd.xlane.f32.xlu1 %v256_v51 }
 0x23c   :  { %v184_v53 = vpop.f32.mrb[0].mxu1 }
 0x23d   :  { %v185_v54 = vadd.f32 %v298_v52, %v184_v53  ;;  %v317_v55 = vpop.f32.mrb[1].mxu1 }
 0x23e   :  { %v187_v56 = vpop.f32.mrb[2].mxu1 }
 0x23f   :  { %191 = vst.msk [vmem:[#allocation2] sm:$0xff] %vm49_vm1, %v185_v54  ;;  %v202_v57 = vsub.f32 %v185_v54, %v423_v2  ;;  %v188_v58 = vadd.f32 %v298_v52, %v187_v56  ;;  %v318_v59 = vpop.f32.mrb[3].mxu1 }
 0x241   :  { %v210_v60 = vmul.f32 %v202_v57, %v202_v57  ;;  %192 = vst.msk [vmem:[#allocation2 + $0x8] sm:$0xff] %vm49_vm1, %v188_v58  ;;  %v203_v61 = vsub.f32 %v188_v58, %v428_v3 }
 0x243   :  { %v211_v62 = vmul.f32 %v203_v61, %v203_v61  ;;  %v212_v63 = vsel %vm49_vm1, %v210_v60, 0.0 }
 0x245   :  { %v213_v0 = vsel %vm49_vm1, %v211_v62, 0.0 }
 0x246   :  { %v214_v1 = vadd.f32 %v213_v0, %v212_v63 }
 0x248   :  { %215 = vadd.xlane.f32.xlu0 %v214_v1 }
 0x249   :  { %347 = shalt.err (!%p344_p4)
}
 0x24a   :  { %s348_s27 = scalar_lea.hbm %s489_s7, 256 }
 0x24b   :  { %p349_p5 = scmp.ne.s32.totalorder %s489_s7, %s348_s27  ;;  %p352_p6 = scmp.lt.u32.totalorder %s348_s27, %s489_s7 }
 0x24d   :  { %p354_p7 = pnand %p352_p6, %p349_p5 }
 0x24f   :  { %357 = shalt.err (!%p354_p7)
}
 0x250   :  { %s365_s11 = smov 128   ;;  %s366_s12 = smov 8  }
 0x251   :  { %281 = dma.vmem_to_hbm [thread:$0]  %s276_s23, 256, %s489_s7, [#allocation3], %s365_s11, %s365_s11, %s366_s12  }
 0x272   :  { %v258_v2 = vpop.xlane.xlu1 %257 }
 0x273   :  { %v259_v3 = vrot.slane %v258_v2, 4 }
 0x275   :  { %v260_v4 = vadd.f32 %v259_v3, %v258_v2 }
 0x277   :  { %v261_v5 = vrot.slane %v260_v4, 2 }
 0x279   :  { %v262_v9 = vadd.f32 %v261_v5, %v260_v4 }
 0x27b   :  { %v263_v12 = vrot.slane %v262_v9, 1 }
 0x27d   :  { %v264_v15 = vadd.f32 %v263_v12, %v262_v9 }
 0x2d5   :  { %v216_v6 = vpop.xlane.xlu0 %215 }
 0x2d6   :  { %v217_v7 = vrot.slane %v216_v6, 4 }
 0x2d8   :  { %v218_v8 = vadd.f32 %v217_v7, %v216_v6 }
 0x2da   :  { %v219_v10 = vrot.slane %v218_v8, 2 }
 0x2dc   :  { %v220_v11 = vadd.f32 %v219_v10, %v218_v8 }
 0x2de   :  { %v221_v13 = vrot.slane %v220_v11, 1 }
 0x2e0   :  { %v222_v14 = vadd.f32 %v221_v13, %v220_v11 }
 0x2e2   :  { %319 = vpush %v222_v14 }
 0x2e3   :  { %321 = vpush %v264_v15 }
 0x313   :  { %s320_s15 = spop %319 }
 0x314   :  { %v266_v16 = vstv %s320_s15  ;;  %s322_s16 = spop %321 }
 0x315   :  { %267 = vst [vmem:[%s490_s8] sm:$0xff] %v266_v16  ;;  %v268_v17 = vstv %s322_s16 }
 0x316   :  { %269 = vst [vmem:[%s491_s9] sm:$0xff] %v268_v17 }
 0x317   :  { %358 = dma.done.wait [#allocation3], 256  }
 0x318   :  { %359 = vsyncadd [#allocation3], 4294967040 }
 0x319   :  { %293 = vsyncpa [#allocation3], 1 }

</bundles_post_ra>
